<compile_context>
chip_gen: v7x
topology: tpu7x:2x2x1
jax: 0.10.0
libtpu: 0.0.40
codegen_flags: <defaults>
</compile_context>

<pallas_src>
import functools
import random

import jax
import jax.numpy as jnp
import numpy as np
from jax.experimental import pallas as pl
from jax.experimental.pallas import tpu as pltpu


# ----------------------------- kernel body ---------------------------------


def _cutout_kernel(xs_ref, ys_ref, x_ref, o_ref, *, batch_block, time_block,
                   n_regions, rect_freq, rect_time):
    """Zero `n_regions` rectangles per batch row of a (TB, F, TT) tile."""
    block_b = pl.program_id(0)
    block_t = pl.program_id(1)
    _, F, TT = x_ref.shape

    # Separable index vectors (tiny).  t_io carries the absolute TIME offset of
    # this block so rectangles straddling TIME-tile boundaries mask correctly.
    f_io = jax.lax.broadcasted_iota(jnp.int32, (F, 1), 0)
    t_io = jax.lax.broadcasted_iota(jnp.int32, (1, TT), 1) + block_t * time_block

    # Hoisted zero operand: built once per grid step, reused for every tb.
    zeros = jnp.zeros((F, TT), x_ref.dtype)

    def body(tb, carry):
        base = (block_b * batch_block + tb) * n_regions
        mask = None
        for r in range(n_regions):                       # R tiny -> static unroll
            x0 = xs_ref[base + r]
            y0 = ys_ref[base + r]
            fm = (f_io >= x0) & (f_io < x0 + rect_freq)  # (F, 1)  tiny
            tm = (t_io >= y0) & (t_io < y0 + rect_time)  # (1, TT) tiny
            rmask = fm & tm                              # one full-width AND
            mask = rmask if mask is None else (mask | rmask)
        xv = x_ref[tb]
        o_ref[tb] = jnp.where(mask, zeros, xv)           # pure select
        return carry

    # fori_loop (not a Python unroll) keeps vreg live ranges bounded as TB grows.
    jax.lax.fori_loop(0, batch_block, body, 0)


# --------------------------- tiling heuristics ------------------------------


def _tpu_params():
    """(vmem_capacity, multi_core?, slab_cap_bytes) with safe fallbacks."""
    vmem_cap = 128 * 1024 * 1024
    try:
        info = pltpu.get_tpu_info()
        vmem_cap = int(getattr(info, "vmem_capacity_bytes", vmem_cap))
    except Exception:
        pass
    # v7x-class chips expose ~64 MiB VMEM per TensorCore and have 2 TCs/chip;
    # v5e/v6e expose 128 MiB and have a single TC.
    multi_core = vmem_cap <= 64 * 1024 * 1024
    slab_cap = (2 * 1024 * 1024) if multi_core else (4 * 1024 * 1024)
    return vmem_cap, multi_core, slab_cap


def _choose_tiling(batch, freq, t_pad, itemsize, slab_cap, multi_core):
    """Pick (TB, TT): TT a 128-multiple dividing t_pad, TB a divisor of batch."""
    # Largest TT (multiple of 128, divides t_pad) whose single-row slab fits.
    tt = 128
    d = t_pad
    while d >= 128:
        if t_pad % d == 0 and d % 128 == 0 and freq * d * itemsize <= slab_cap:
            tt = d
            break
        d -= 128
    row_bytes = freq * tt * itemsize
    grid_t = t_pad // tt

    def ok(tb):
        if tb * row_bytes > slab_cap:
            return False
        if multi_core:
            steps = (batch // tb) * grid_t
            if steps < 2 or steps % 2 != 0:
                return False
        return True

    tb = 1
    for cand in range(1, batch + 1):
        if batch % cand == 0 and ok(cand):
            tb = cand
    if multi_core and not ok(tb):
        # Evenness impossible (e.g. odd batch * grid_t): fall back to best fit.
        for cand in range(1, batch + 1):
            if batch % cand == 0 and cand * row_bytes <= slab_cap:
                tb = cand
    return tb, tt


# ------------------------------- wrapper ------------------------------------


def spec_cutout_regions(x, x_starts, y_starts, *, rect_freq, rect_time,
                        donate_input=False):
    """x: (B, FREQ, TIME); x_starts, y_starts: (B, R) int32 rectangle corners."""
    B, F, T = x.shape
    R = x_starts.shape[1]

    if R == 0:
        # cutout_rect_regions == 0 -> identity (no rectangles).
        return x

    itemsize = x.dtype.itemsize
    vmem_cap, multi_core, slab_cap = _tpu_params()

    # Pad TIME up to a multiple of 128 so every output store is a full-lane vst.
    T_pad = ((T + 127) // 128) * 128
    x_in = x if T_pad == T else jnp.pad(x, ((0, 0), (0, 0), (0, T_pad - T)))

    TB, TT = _choose_tiling(B, F, T_pad, itemsize, slab_cap, multi_core)
    grid_b = B // TB
    grid_t = T_pad // TT

    slab_bytes = TB * F * TT * itemsize
    # 1 input + 1 output, double-buffered -> ~4x slab; leave generous headroom.
    vmem_limit = int(min(vmem_cap // 2, max(32 * 1024 * 1024, 6 * slab_bytes)))

    # Flat 1D corner tables avoid the 2D SMEM padding blow-up.
    xs_flat = jnp.asarray(x_starts, dtype=jnp.int32).reshape(-1)
    ys_flat = jnp.asarray(y_starts, dtype=jnp.int32).reshape(-1)

    kernel = functools.partial(
        _cutout_kernel,
        batch_block=TB,
        time_block=TT,
        n_regions=R,
        rect_freq=rect_freq,
        rect_time=rect_time,
    )

    out = pl.pallas_call(
        kernel,
        out_shape=jax.ShapeDtypeStruct((B, F, T_pad), x.dtype),
        grid_spec=pltpu.PrefetchScalarGridSpec(
            num_scalar_prefetch=2,
            grid=(grid_b, grid_t),
            in_specs=[
                pl.BlockSpec((TB, F, TT), lambda b, t, xs, ys: (b, 0, t)),
            ],
            out_specs=pl.BlockSpec((TB, F, TT), lambda b, t, xs, ys: (b, 0, t)),
        ),
        compiler_params=pltpu.CompilerParams(
            dimension_semantics=("parallel", "parallel"),
            vmem_limit_bytes=vmem_limit,
        ),
        cost_estimate=pl.CostEstimate(
            flops=0,
            transcendentals=0,
            bytes_accessed=2 * B * F * T_pad * itemsize,
        ),
        # Optional buffer reuse (x is arg index 2 after the two prefetch tables).
        input_output_aliases=({2: 0} if donate_input else {}),
    )(xs_flat, ys_flat, x_in)

    return out if T_pad == T else out[:, :, :T]


# ------------------------------ reference -----------------------------------


def _reference(x, x_starts, y_starts, rect_freq, rect_time):
    # Pure-numpy reference reproducing the PyTorch masked_fill loop.
    x_np = np.array(jax.device_get(x), copy=True)
    xs = jax.device_get(x_starts)
    ys = jax.device_get(y_starts)
    for b in range(x_np.shape[0]):
        for r in range(xs.shape[1]):
            x0, y0 = int(xs[b, r]), int(ys[b, r])
            x_np[b, x0: x0 + rect_freq, y0: y0 + rect_time] = 0
    return x_np


def _draw_corners(rng, batch, regions, freq, time, rect_freq, rect_time):
    # Mirrors `int(self._rng.uniform(0, sh[dim] - size))` in the PyTorch module.
    xs_list, ys_list = [], []
    for _ in range(batch):
        xs_row, ys_row = [], []
        for _ in range(regions):
            xs_row.append(int(rng.uniform(0, freq - rect_freq)))
            ys_row.append(int(rng.uniform(0, time - rect_time)))
        xs_list.append(xs_row)
        ys_list.append(ys_row)
    return (jnp.asarray(xs_list, dtype=jnp.int32),
            jnp.asarray(ys_list, dtype=jnp.int32))


if __name__ == "__main__":
    cfg = {
        "cutout_rect_regions": 2,
        "cutout_rect_time": 5,
        "cutout_rect_freq": 20,
    }
    R = cfg["cutout_rect_regions"]
    rect_freq = cfg["cutout_rect_freq"]
    rect_time = cfg["cutout_rect_time"]

    key = jax.random.PRNGKey(0)
    rng = random.Random(0)

    # Case 1: lane-dense TIME (no padding needed).
    B, FREQ, TIME = 4, 80, 128
    k1, k2 = jax.random.split(key)
    x1 = jax.random.normal(k1, (B, FREQ, TIME), dtype=jnp.float32)
    xs1, ys1 = _draw_corners(rng, B, R, FREQ, TIME, rect_freq, rect_time)
    out1 = spec_cutout_regions(x1, xs1, ys1,
                               rect_freq=rect_freq, rect_time=rect_time)
    out1 = jax.block_until_ready(out1)
    ref1 = _reference(x1, xs1, ys1, rect_freq, rect_time)
    np.testing.assert_allclose(jax.device_get(out1), ref1, rtol=0, atol=0)

    # Case 2: TIME not a multiple of 128 (exercises the padding/slice path).
    B2, FREQ2, TIME2 = 2, 40, 96
    x2 = jax.random.normal(k2, (B2, FREQ2, TIME2), dtype=jnp.float32)
    xs2, ys2 = _draw_corners(rng, B2, R, FREQ2, TIME2, rect_freq, rect_time)
    out2 = spec_cutout_regions(x2, xs2, ys2,
                               rect_freq=rect_freq, rect_time=rect_time)
    out2 = jax.block_until_ready(out2)
    ref2 = _reference(x2, xs2, ys2, rect_freq, rect_time)
    np.testing.assert_allclose(jax.device_get(out2), ref2, rtol=0, atol=0)

    print("KERNEL_OK")
</pallas_src>

<mosaic_0001>
module attributes {stable_mosaic.version = 11 : i64} {
  func.func @_cutout_kernel(%arg0: i32, %arg1: i32, %arg2: memref<8xi32, #tpu.memory_space<smem>>, %arg3: memref<8xi32, #tpu.memory_space<smem>>, %arg4: memref<4x80x128xf32, #tpu.memory_space<vmem>>, %arg5: memref<4x80x128xf32, #tpu.memory_space<vmem>>) attributes {dimension_semantics = [#tpu.dimension_semantics<parallel>, #tpu.dimension_semantics<parallel>], iteration_bounds = array<i64: 1, 1>, scalar_prefetch = 2 : i64, scratch_operands = 0 : i64, tpu.core_type = #tpu.core_type<tc>, window_params = [{transform_indices = @transform_0, window_bounds = array<i64: 4, 80, 128>}, {transform_indices = @transform_1, window_bounds = array<i64: 4, 80, 128>}]} {
    %0 = tpu.iota {dimensions = array<i32: 0>} : vector<80x1xi32>
    %1 = tpu.iota {dimensions = array<i32: 1>} : vector<1x128xi32>
    %c128_i32 = arith.constant 128 : i32
    %2 = arith.muli %arg1, %c128_i32 : i32
    %3 = vector.broadcast %2 : i32 to vector<1x128xi32>
    %4 = arith.addi %1, %3 : vector<1x128xi32>
    %cst = arith.constant 0.000000e+00 : f32
    %5 = vector.broadcast %cst : f32 to vector<80x128xf32>
    %c0_i32 = arith.constant 0 : i32
    %c4_i32 = arith.constant 4 : i32
    %6 = arith.addi %c0_i32, %c4_i32 : i32
    %c1_i32 = arith.constant 1 : i32
    scf.for %arg6 = %c0_i32 to %6 step %c1_i32  : i32 {
      %c4_i32_1 = arith.constant 4 : i32
      %7 = arith.muli %arg0, %c4_i32_1 : i32
      %8 = arith.addi %7, %arg6 : i32
      %c2_i32 = arith.constant 2 : i32
      %9 = arith.muli %8, %c2_i32 : i32
      %c0_i32_2 = arith.constant 0 : i32
      %10 = arith.addi %9, %c0_i32_2 : i32
      %11 = arith.index_cast %10 : i32 to index
      %12 = memref.load %arg2[%11] : memref<8xi32, #tpu.memory_space<smem>>
      %c0_i32_3 = arith.constant 0 : i32
      %13 = arith.addi %9, %c0_i32_3 : i32
      %14 = arith.index_cast %13 : i32 to index
      %15 = memref.load %arg3[%14] : memref<8xi32, #tpu.memory_space<smem>>
      %16 = vector.broadcast %12 : i32 to vector<80x1xi32>
      %17 = arith.cmpi sge, %0, %16 : vector<80x1xi32>
      %c20_i32 = arith.constant 20 : i32
      %18 = arith.addi %12, %c20_i32 : i32
      %19 = vector.broadcast %18 : i32 to vector<80x1xi32>
      %20 = arith.cmpi slt, %0, %19 : vector<80x1xi32>
      %21 = arith.andi %17, %20 : vector<80x1xi1>
      %22 = vector.broadcast %15 : i32 to vector<1x128xi32>
      %23 = arith.cmpi sge, %4, %22 : vector<1x128xi32>
      %c5_i32 = arith.constant 5 : i32
      %24 = arith.addi %15, %c5_i32 : i32
      %25 = vector.broadcast %24 : i32 to vector<1x128xi32>
      %26 = arith.cmpi slt, %4, %25 : vector<1x128xi32>
      %27 = arith.andi %23, %26 : vector<1x128xi1>
      %28 = vector.broadcast %21 : vector<80x1xi1> to vector<80x128xi1>
      %29 = vector.broadcast %27 : vector<1x128xi1> to vector<80x128xi1>
      %30 = arith.andi %28, %29 : vector<80x128xi1>
      %c1_i32_4 = arith.constant 1 : i32
      %31 = arith.addi %9, %c1_i32_4 : i32
      %32 = arith.index_cast %31 : i32 to index
      %33 = memref.load %arg2[%32] : memref<8xi32, #tpu.memory_space<smem>>
      %c1_i32_5 = arith.constant 1 : i32
      %34 = arith.addi %9, %c1_i32_5 : i32
      %35 = arith.index_cast %34 : i32 to index
      %36 = memref.load %arg3[%35] : memref<8xi32, #tpu.memory_space<smem>>
      %37 = vector.broadcast %33 : i32 to vector<80x1xi32>
      %38 = arith.cmpi sge, %0, %37 : vector<80x1xi32>
      %c20_i32_6 = arith.constant 20 : i32
      %39 = arith.addi %33, %c20_i32_6 : i32
      %40 = vector.broadcast %39 : i32 to vector<80x1xi32>
      %41 = arith.cmpi slt, %0, %40 : vector<80x1xi32>
      %42 = arith.andi %38, %41 : vector<80x1xi1>
      %43 = vector.broadcast %36 : i32 to vector<1x128xi32>
      %44 = arith.cmpi sge, %4, %43 : vector<1x128xi32>
      %c5_i32_7 = arith.constant 5 : i32
      %45 = arith.addi %36, %c5_i32_7 : i32
      %46 = vector.broadcast %45 : i32 to vector<1x128xi32>
      %47 = arith.cmpi slt, %4, %46 : vector<1x128xi32>
      %48 = arith.andi %44, %47 : vector<1x128xi1>
      %49 = vector.broadcast %42 : vector<80x1xi1> to vector<80x128xi1>
      %50 = vector.broadcast %48 : vector<1x128xi1> to vector<80x128xi1>
      %51 = arith.andi %49, %50 : vector<80x128xi1>
      %52 = arith.ori %30, %51 : vector<80x128xi1>
      %53 = arith.index_cast %arg6 : i32 to index
      %c0 = arith.constant 0 : index
      %c0_8 = arith.constant 0 : index
      %54 = vector.load %arg4[%53, %c0, %c0_8] : memref<4x80x128xf32, #tpu.memory_space<vmem>>, vector<1x80x128xf32>
      %55 = vector.shape_cast %54 : vector<1x80x128xf32> to vector<80x128xf32>
      %56 = arith.select %52, %5, %55 : vector<80x128xi1>, vector<80x128xf32>
      %57 = arith.index_cast %arg6 : i32 to index
      %c0_9 = arith.constant 0 : index
      %c0_10 = arith.constant 0 : index
      %58 = vector.load %arg5[%57, %c0_9, %c0_10] : memref<4x80x128xf32, #tpu.memory_space<vmem>>, vector<1x80x128xf32>
      %59 = vector.shape_cast %58 : vector<1x80x128xf32> to vector<80x128xf32>
      %60 = vector.shape_cast %56 : vector<80x128xf32> to vector<1x80x128xf32>
      tpu.vector_store %arg5[%57, %c0_9, %c0_10], %60 {strides = array<i32>} : memref<4x80x128xf32, #tpu.memory_space<vmem>>, vector<1x80x128xf32>,
    }
    %c4_i32_0 = arith.constant 4 : i32
    return
  }
  func.func @transform_0(%arg0: i32, %arg1: i32, %arg2: memref<8xi32, #tpu.memory_space<smem>>, %arg3: memref<8xi32, #tpu.memory_space<smem>>) -> (i32, i32, i32) {
    %c0_i32 = arith.constant 0 : i32
    %c0_i32_0 = arith.constant 0 : i32
    return %arg0, %c0_i32, %arg1 : i32, i32, i32
  }
  func.func @transform_1(%arg0: i32, %arg1: i32, %arg2: memref<8xi32, #tpu.memory_space<smem>>, %arg3: memref<8xi32, #tpu.memory_space<smem>>) -> (i32, i32, i32) {
    %c0_i32 = arith.constant 0 : i32
    %c0_i32_0 = arith.constant 0 : i32
    return %arg0, %c0_i32, %arg1 : i32, i32, i32
  }
}

</mosaic_0001>

<bundles_post_ra>
// kernel: tpu_custom_call.1
= control target key start
LH: loop header
LB: loop body
LE: loop exit
PB: predicated region body
PF: predicated region fallthrough
CT: control target
= control target key end

     0   :  { %s655_s0 = inlined_call_operand.hbm [shape: s32[8], index: 0, kind: input, shape index: {}]   ;;  %s656_s2 = inlined_call_operand.hbm [shape: f32[4,80,128], index: 2, kind: input, shape index: {}]   ;;  %s657_s3 = inlined_call_operand.hbm [shape: f32[4,80,128], index: 3, kind: output, shape index: {}]   ;;  %s658_s1 = inlined_call_operand.vmem [shape: s32[8], index: 1, kind: input, shape index: {}]  }
   0x1   :  { %s289_s14 = scalar_lea.hbm %s655_s0, 16 }
   0x2   :  { %p290_p0 = scmp.ne.s32.totalorder %s655_s0, %s289_s14  ;;  %p293_p1 = scmp.lt.u32.totalorder %s289_s14, %s655_s0 }
   0x4   :  { %p295_p2 = pnand %p293_p1, %p290_p0 }
   0x6   :  { %298 = shalt.err (!%p295_p2)  }
   0x7   :  { %s369_s19 = smov [#allocation3]   ;;  %s10_s24 = sshll.u32 %s658_s1, 4  ;;  %s11_s24 = int_to_ptr.vmem [resolvable:$true] %s10_s24 }
   0x8   :  { %9 = dma.hbm_to_smem %s655_s0, 16, %s369_s19, [#allocation2] }
   0x9   :  { %s299_s25 = scalar_lea.vmem %s11_s24, 16  ;;  %p304_p4 = scmp.lt.s32.totalorder %s11_s24, %s11_s24 }
   0xa   :  { %p300_p3 = scmp.ne.s32.totalorder %s11_s24, %s299_s25  ;;  %p305_p5 = scmp.lt.s32.totalorder %s299_s25, %s299_s25 }
   0xc   :  { %p306_p6 = por %p305_p5, %p304_p4 }
   0xe   :  { %p307_p7 = pnand %p306_p6, %p300_p3 }
  0x10   :  { %310 = shalt.err (!%p307_p7)  }
  0x11   :  { %s370_s26 = smov [#allocation4]  }
  0x12   :  { %13 = dma.vmem_to_smem %s11_s24, 16, %s370_s26, [#allocation2] }
  0x13   :  { %359 = dma.done.wait [#allocation2], 32 }
  0x14   :  { %360 = vsyncadd [#allocation2], 4294967264 }
  0x15   :  { %15 = sfence }
  0x16   :  { %16 = vsyncpa [#allocation6], 0 }
  0x17   :  { %17 = vsyncpa [#allocation7], 0  ;;  %s371_s0 = smov [#allocation5]   ;;  %s311_s29 = scalar_lea.hbm %s656_s2, 5120 }
  0x18   :  { %s23_s27 = sshll.u32 %s371_s0, 4  ;;  %p312_p8 = scmp.ne.s32.totalorder %s656_s2, %s311_s29  ;;  %s24_s27 = int_to_ptr.vmem [resolvable:$true] %s23_s27 }
  0x19   :  { %p315_p9 = scmp.lt.u32.totalorder %s311_s29, %s656_s2 }
  0x1b   :  { %p317_p10 = pnand %p315_p9, %p312_p8 }
  0x1d   :  { %320 = shalt.err (!%p317_p10)
}
  0x1e   :  { %s321_s7 = scalar_lea.vmem %s24_s27, 5120  ;;  %p326_p12 = scmp.lt.s32.totalorder %s24_s27, %s24_s27 }
  0x1f   :  { %p322_p11 = scmp.ne.s32.totalorder %s24_s27, %s321_s7  ;;  %p327_p13 = scmp.lt.s32.totalorder %s321_s7, %s321_s7 }
  0x21   :  { %p328_p0 = por %p327_p13, %p326_p12 }
  0x23   :  { %p329_p1 = pnand %p328_p0, %p322_p11 }
  0x25   :  { %332 = shalt.err (!%p329_p1)
}
  0x26   :  { %s372_s8 = smov 128   ;;  %s373_s9 = smov 8  }
  0x27   :  { %29 = dma.hbm_to_vmem [thread:$0]  %s656_s2, 5120, %s24_s27, [#allocation6], %s372_s8, %s372_s8, %s373_s9  }
  0x28   :  { %361 = dma.done.wait [#allocation6], 5120  }
  0x29   :  { %362 = vsyncadd [#allocation6], 4294962176  ;;  %v33_v0 = vlaneseq  ;;  %s456_s2 = smov 0  }
  0x2b   :  { %v425_v1 = vshrl.u32 %v33_v0, 7  ;;  %v427_v2 = vand.u32 127, %v33_v0 }
  0x2d   :  { %v430_v3 = vadd.s32 8, %v425_v1  ;;  %v433_v4 = vadd.s32 16, %v425_v1  ;;  %v436_v5 = vadd.s32 24, %v425_v1  ;;  %v439_v6 = vadd.s32 32, %v425_v1 }
  0x2e   :  { %v442_v7 = vadd.s32 40, %v425_v1  ;;  %v445_v8 = vadd.s32 48, %v425_v1  ;;  %v448_v9 = vadd.s32 56, %v425_v1  ;;  %v451_v10 = vadd.s32 64, %v425_v1 }
  0x2f   :  { %v454_v11 = vadd.s32 72, %v425_v1 }
  0x30 LB: > { %s274_s12 = sshll.u32 %s367_s2, 1  ;;  %s215_s18 = smul.u32 80, %s367_s2  ;;  %s367_s2 = sphi %s456_s2, %s54_s2  }
  0x31   : > { %s58_s13 = sld [smem:[#allocation3 + %s274_s12]]  ;;  %s131_s15 = sadd.s32 1, %s274_s12 }
  0x32   : > { %s59_s14 = sld [smem:[#allocation4 + %s274_s12]]  ;;  %s501_s23 = scalar_lea.vmem [#allocation5], %s215_s18 }
  0x33   : > { %s132_s16 = sld [smem:[#allocation3 + %s131_s15]]  ;;  %v217_v23 = vld [vmem:[%s501_s23] sm:$0xff]  ;;  %s516_s24 = scalar_lea.vmem [#allocation8], %s215_s18  ;;  %v218_v25 = vld [vmem:[%s501_s23 + $0x8] sm:$0xff]  ;;  %v219_v27 = vld [vmem:[%s501_s23 + $0x10] sm:$0xff] }
  0x34   : > { %s133_s17 = sld [smem:[#allocation4 + %s131_s15]]  ;;  %v220_v29 = vld [vmem:[%s501_s23 + $0x18] sm:$0xff]  ;;  %v221_v31 = vld [vmem:[%s501_s23 + $0x20] sm:$0xff]  ;;  %v222_v33 = vld [vmem:[%s501_s23 + $0x28] sm:$0xff]  ;;  %s54_s2 = sadd.s32 1, %s367_s2  }
  0x35   : > { %v223_v35 = vld [vmem:[%s501_s23 + $0x30] sm:$0xff]  ;;  %v224_v37 = vld [vmem:[%s501_s23 + $0x38] sm:$0xff]  ;;  %v225_v39 = vld [vmem:[%s501_s23 + $0x40] sm:$0xff]  ;;  %p51_p2 = scmp.ge.s32.totalorder %s54_s2, 4  }
  0x36   : > { %v226_v41 = vld [vmem:[%s501_s23 + $0x48] sm:$0xff]  ;;  %s374_s25 = smov (%p51_p2), [#allocation8]  }
  0x37   : > { %v463_v12 = vstv %s58_s13  ;;  %s71_s19 = sadd.s32 20, %s58_s13  ;;  %s253_s26 = sshll.u32 (%p51_p2), %s374_s25, 4  ;;  %s254_s26 = int_to_ptr.vmem [resolvable:$true] %s253_s26 }
  0x38   : > { %v93_v13 = vstv %s59_s14  ;;  %s95_s20 = sadd.s32 5, %s59_s14  ;;  %vm61_vm0 = vcmp.ge.s32.totalorder %v425_v1, %v463_v12  ;;  %v467_v14 = vstv %s71_s19  ;;  %vm62_vm13 = vcmp.ge.s32.totalorder %v430_v3, %v463_v12  ;;  %s333_s0 = scalar_lea.vmem (%p51_p2), %s254_s26, 5120 }
  0x39   : > { %vm94_vm1 = vcmp.ge.s32.totalorder %v427_v2, %v93_v13  ;;  %v96_v15 = vstv %s95_s20  ;;  %vm73_vm2 = vcmp.lt.s32.totalorder %v425_v1, %v467_v14  ;;  %v473_v16 = vstv %s132_s16  ;;  %s145_s21 = sadd.s32 20, %s132_s16  ;;  %p334_p3 = scmp.ne.s32.totalorder (%p51_p2), %s254_s26, %s333_s0 }
  0x3a   : > { %vm97_vm3 = vcmp.lt.s32.totalorder %v427_v2, %v96_v15  ;;  %v167_v17 = vstv %s133_s17  ;;  %s169_s22 = sadd.s32 5, %s133_s17  ;;  %vm475_vm4 = vmand %vm61_vm0, %vm73_vm2  ;;  %vm135_vm5 = vcmp.ge.s32.totalorder %v425_v1, %v473_v16  ;;  %v481_v19 = vstv %s145_s21  ;;  %p338_p4 = scmp.lt.s32.totalorder (%p51_p2), %s254_s26, %s254_s26 }
  0x3b   : > { %v170_v20 = vstv %s169_s22  ;;  %vm483_vm6 = vmand %vm94_vm1, %vm97_vm3  ;;  %vm147_vm7 = vcmp.lt.s32.totalorder %v425_v1, %v481_v19  ;;  %vm168_vm8 = vcmp.ge.s32.totalorder %v427_v2, %v167_v17  ;;  %vm74_vm14 = vcmp.lt.s32.totalorder %v430_v3, %v467_v14  ;;  %p339_p5 = scmp.lt.s32.totalorder (%p51_p2), %s333_s0, %s333_s0 }
  0x3c   : > { %vm171_vm9 = vcmp.lt.s32.totalorder %v427_v2, %v170_v20  ;;  %vm121_vm10 = vmand %vm475_vm4, %vm483_vm6  ;;  %vm136_vm1 = vcmp.ge.s32.totalorder %v430_v3, %v473_v16  ;;  %vm148_vm2 = vcmp.lt.s32.totalorder %v430_v3, %v481_v19 }
  0x3d   : > { %vm157_vm11 = vmand %vm135_vm5, %vm147_vm7  ;;  %vm63_vm7 = vcmp.ge.s32.totalorder %v433_v4, %v463_v12  ;;  %p340_p6 = por (%p51_p2), %p339_p5, %p338_p4 }
  0x3e   : > { %vm495_vm12 = vmand %vm168_vm8, %vm171_vm9  ;;  %vm75_vm8 = vcmp.lt.s32.totalorder %v433_v4, %v467_v14 }
  0x3f   : > { %vm195_vm15 = vmand %vm157_vm11, %vm495_vm12  ;;  %vm137_vm11 = vcmp.ge.s32.totalorder %v433_v4, %v473_v16  ;;  %p341_p7 = pnand (%p51_p2), %p340_p6, %p334_p3 }
  0x40   : > { %vm205_vm0 = vmor %vm121_vm10, %vm195_vm15 }
  0x41   : > { %v227_v24 = vsel %vm205_vm0, 0.0, %v217_v23  ;;  %vm84_vm3 = vmand %vm62_vm13, %vm74_vm14  ;;  %vm149_vm13 = vcmp.lt.s32.totalorder %v433_v4, %v481_v19 }
  0x42   : > { %238 = vst [vmem:[%s516_s24] sm:$0xff] %v227_v24  ;;  %vm122_vm4 = vmand %vm84_vm3, %vm483_vm6 }
  0x43   : > { %vm158_vm5 = vmand %vm136_vm1, %vm148_vm2  ;;  %vm64_vm1 = vcmp.ge.s32.totalorder %v436_v5, %v463_v12  ;;  %vm76_vm2 = vcmp.lt.s32.totalorder %v436_v5, %v467_v14 }
  0x44   : > { %vm196_vm9 = vmand %vm158_vm5, %vm495_vm12  ;;  %vm138_vm5 = vcmp.ge.s32.totalorder %v436_v5, %v473_v16 }
  0x45   : > { %vm206_vm10 = vmor %vm122_vm4, %vm196_vm9 }
  0x46   : > { %v228_v26 = vsel %vm206_vm10, 0.0, %v218_v25  ;;  %vm85_vm14 = vmand %vm63_vm7, %vm75_vm8  ;;  %vm150_vm7 = vcmp.lt.s32.totalorder %v436_v5, %v481_v19 }
  0x47   : > { %239 = vst [vmem:[%s516_s24 + $0x8] sm:$0xff] %v228_v26  ;;  %vm123_vm15 = vmand %vm85_vm14, %vm483_vm6 }
  0x48   : > { %vm159_vm0 = vmand %vm137_vm11, %vm149_vm13  ;;  %vm65_vm11 = vcmp.ge.s32.totalorder %v439_v6, %v463_v12  ;;  %vm77_vm13 = vcmp.lt.s32.totalorder %v439_v6, %v467_v14 }
  0x49   : > { %vm197_vm3 = vmand %vm159_vm0, %vm495_vm12  ;;  %vm139_vm0 = vcmp.ge.s32.totalorder %v439_v6, %v473_v16 }
  0x4a   : > { %vm207_vm4 = vmor %vm123_vm15, %vm197_vm3 }
  0x4b   : > { %v229_v28 = vsel %vm207_vm4, 0.0, %v219_v27  ;;  %vm86_vm8 = vmand %vm64_vm1, %vm76_vm2  ;;  %vm151_vm1 = vcmp.lt.s32.totalorder %v439_v6, %v481_v19 }
  0x4c   : > { %240 = vst [vmem:[%s516_s24 + $0x10] sm:$0xff] %v229_v28  ;;  %vm124_vm9 = vmand %vm86_vm8, %vm483_vm6 }
  0x4d   : > { %vm160_vm10 = vmand %vm138_vm5, %vm150_vm7  ;;  %vm66_vm5 = vcmp.ge.s32.totalorder %v442_v7, %v463_v12  ;;  %vm78_vm7 = vcmp.lt.s32.totalorder %v442_v7, %v467_v14 }
  0x4e   : > { %vm198_vm14 = vmand %vm160_vm10, %vm495_vm12  ;;  %vm140_vm10 = vcmp.ge.s32.totalorder %v442_v7, %v473_v16 }
  0x4f   : > { %vm208_vm15 = vmor %vm124_vm9, %vm198_vm14 }
  0x50   : > { %v230_v30 = vsel %vm208_vm15, 0.0, %v220_v29  ;;  %vm87_vm2 = vmand %vm65_vm11, %vm77_vm13  ;;  %vm152_vm11 = vcmp.lt.s32.totalorder %v442_v7, %v481_v19 }
  0x51   : > { %241 = vst [vmem:[%s516_s24 + $0x18] sm:$0xff] %v230_v30  ;;  %vm125_vm3 = vmand %vm87_vm2, %vm483_vm6 }
  0x52   : > { %vm161_vm4 = vmand %vm139_vm0, %vm151_vm1  ;;  %vm67_vm0 = vcmp.ge.s32.totalorder %v445_v8, %v463_v12  ;;  %vm79_vm1 = vcmp.lt.s32.totalorder %v445_v8, %v467_v14 }
  0x53   : > { %vm199_vm8 = vmand %vm161_vm4, %vm495_vm12  ;;  %vm141_vm4 = vcmp.ge.s32.totalorder %v445_v8, %v473_v16 }
  0x54   : > { %vm209_vm9 = vmor %vm125_vm3, %vm199_vm8 }
  0x55   : > { %v231_v32 = vsel %vm209_vm9, 0.0, %v221_v31  ;;  %vm88_vm13 = vmand %vm66_vm5, %vm78_vm7  ;;  %vm153_vm5 = vcmp.lt.s32.totalorder %v445_v8, %v481_v19 }
  0x56   : > { %242 = vst [vmem:[%s516_s24 + $0x20] sm:$0xff] %v231_v32  ;;  %vm126_vm14 = vmand %vm88_vm13, %vm483_vm6 }
  0x57   : > { %vm162_vm15 = vmand %vm140_vm10, %vm152_vm11  ;;  %vm68_vm10 = vcmp.ge.s32.totalorder %v448_v9, %v463_v12  ;;  %vm80_vm11 = vcmp.lt.s32.totalorder %v448_v9, %v467_v14 }
  0x58   : > { %vm200_vm2 = vmand %vm162_vm15, %vm495_vm12  ;;  %vm142_vm15 = vcmp.ge.s32.totalorder %v448_v9, %v473_v16 }
  0x59   : > { %vm210_vm3 = vmor %vm126_vm14, %vm200_vm2 }
  0x5a   : > { %v232_v34 = vsel %vm210_vm3, 0.0, %v222_v33  ;;  %vm89_vm7 = vmand %vm67_vm0, %vm79_vm1  ;;  %vm154_vm0 = vcmp.lt.s32.totalorder %v448_v9, %v481_v19 }
  0x5b   : > { %243 = vst [vmem:[%s516_s24 + $0x28] sm:$0xff] %v232_v34  ;;  %vm127_vm8 = vmand %vm89_vm7, %vm483_vm6 }
  0x5c   : > { %vm163_vm9 = vmand %vm141_vm4, %vm153_vm5  ;;  %vm69_vm4 = vcmp.ge.s32.totalorder %v451_v10, %v463_v12  ;;  %vm81_vm5 = vcmp.lt.s32.totalorder %v451_v10, %v467_v14 }
  0x5d   : > { %vm201_vm13 = vmand %vm163_vm9, %vm495_vm12  ;;  %vm143_vm9 = vcmp.ge.s32.totalorder %v451_v10, %v473_v16 }
  0x5e   : > { %vm211_vm14 = vmor %vm127_vm8, %vm201_vm13 }
  0x5f   : > { %v233_v36 = vsel %vm211_vm14, 0.0, %v223_v35  ;;  %vm90_vm1 = vmand %vm68_vm10, %vm80_vm11  ;;  %vm155_vm10 = vcmp.lt.s32.totalorder %v451_v10, %v481_v19 }
  0x60   : > { %244 = vst [vmem:[%s516_s24 + $0x30] sm:$0xff] %v233_v36  ;;  %vm128_vm2 = vmand %vm90_vm1, %vm483_vm6 }
  0x61   : > { %vm164_vm3 = vmand %vm142_vm15, %vm154_vm0  ;;  %vm70_vm15 = vcmp.ge.s32.totalorder %v454_v11, %v463_v12  ;;  %vm82_vm0 = vcmp.lt.s32.totalorder %v454_v11, %v467_v14 }
  0x62   : > { %vm202_vm7 = vmand %vm164_vm3, %vm495_vm12  ;;  %vm144_vm3 = vcmp.ge.s32.totalorder %v454_v11, %v473_v16 }
  0x63   : > { %vm212_vm8 = vmor %vm128_vm2, %vm202_vm7 }
  0x64   : > { %v234_v38 = vsel %vm212_vm8, 0.0, %v224_v37  ;;  %vm91_vm11 = vmand %vm69_vm4, %vm81_vm5  ;;  %vm156_vm4 = vcmp.lt.s32.totalorder %v454_v11, %v481_v19 }
  0x65   : > { %245 = vst [vmem:[%s516_s24 + $0x38] sm:$0xff] %v234_v38  ;;  %vm129_vm13 = vmand %vm91_vm11, %vm483_vm6 }
  0x66   : > { %vm165_vm14 = vmand %vm143_vm9, %vm155_vm10 }
  0x67   : > { %vm203_vm1 = vmand %vm165_vm14, %vm495_vm12 }
  0x68   : > { %vm213_vm2 = vmor %vm129_vm13, %vm203_vm1 }
  0x69   : > { %v235_v40 = vsel %vm213_vm2, 0.0, %v225_v39  ;;  %vm92_vm5 = vmand %vm70_vm15, %vm82_vm0  ;;  %53 = sbr.rel (!%p51_p2) target bundleno = 48 (0x30), region = 37 }
  0x6a   : > { %246 = vst [vmem:[%s516_s24 + $0x40] sm:$0xff] %v235_v40  ;;  %vm130_vm7 = vmand %vm92_vm5, %vm483_vm6 }
  0x6b   : > { %vm166_vm8 = vmand %vm144_vm3, %vm156_vm4 }
  0x6c   : > { %vm204_vm9 = vmand %vm166_vm8, %vm495_vm12 }
  0x6d   : > { %vm214_vm10 = vmor %vm130_vm7, %vm204_vm9 }
  0x6e   : > { %v236_v42 = vsel %vm214_vm10, 0.0, %v226_v41 }
  0x6f   : > { %247 = vst [vmem:[%s516_s24 + $0x48] sm:$0xff] %v236_v42 }
  0x70   :  { %344 = shalt.err (!%p341_p7)
}
  0x71   :  { %s345_s1 = scalar_lea.hbm %s657_s3, 5120 }
  0x72   :  { %p346_p8 = scmp.ne.s32.totalorder %s657_s3, %s345_s1  ;;  %p349_p9 = scmp.lt.u32.totalorder %s345_s1, %s657_s3 }
  0x74   :  { %p351_p10 = pnand %p349_p9, %p346_p8 }
  0x76   :  { %354 = shalt.err (!%p351_p10)
}
  0x77   :  { %259 = dma.vmem_to_hbm [thread:$0]  %s254_s26, 5120, %s657_s3, [#allocation7], %s372_s8, %s372_s8, %s373_s9  }
  0x78   :  { %363 = dma.done.wait [#allocation7], 5120  }
  0x79   :  { %364 = vsyncadd [#allocation7], 4294962176 }
  0x7a   :  { %263 = vsyncpa [#allocation6], 1 }
  0x7b   :  { %264 = vsyncpa [#allocation7], 1 }

</bundles_post_ra>
